<compile_context>
chip_gen: v6e
topology: v6e:2x2x1
jax: 0.10.0
libtpu: 0.0.40
codegen_flags: <defaults>
</compile_context>

<pallas_src>
import functools

import jax
import jax.numpy as jnp
from jax.experimental import pallas as pl
from jax.experimental.pallas import tpu as pltpu


_LANE = 128        # lane granule (last dim of the (8,128) vreg tile)
_SUBLANE = 8       # sublane granule (second-to-last dim, f32)
_VMEM_LIMIT_BYTES = 32 * 1024 * 1024   # explicit scoped-VMEM request (safe on v5e/v6e/v7x)
_VMEM_BUDGET = 20 * 1024 * 1024        # self-imposed headroom under the limit
_MIN_SPLIT_ROWS = 256                  # only force >=2 grid steps if each keeps >= this many rows


def _round_up(n, m):
    return ((n + m - 1) // m) * m


def _cdiv(a, b):
    return -(-a // b)


def _tile_bytes(rows, cols, itemsize):
    """VMEM footprint of a (rows, cols) block in the (8,128)-tiled layout."""
    return _round_up(rows, _SUBLANE) * _round_up(cols, _LANE) * itemsize


def _mlp_kernel(n_linear, *refs):
    """refs = (x_ref, w0, b0, w1, b1, ..., w_{L-1}, b_{L-1}, o_ref).

    Whole MLP on one (tb, *) batch tile; weights/biases are VMEM-resident
    (constant index_map).  MXU is fed in the native param dtype, accumulation
    is f32; bias-add + ReLU happen on the f32 accumulator.
    """
    x_ref = refs[0]
    o_ref = refs[-1]
    p = refs[1:-1]
    assert len(p) == 2 * n_linear

    x = x_ref[...]                       # (tb, input_size) — HBM-exact, no padded HBM copy
    tb, in_size = x.shape
    k0 = p[0].shape[0]                   # first layer's lane-padded K width
    if k0 > in_size:                     # zero-extend inside the kernel (VMEM/vregs only)
        x = jnp.concatenate(
            [x, jnp.zeros((tb, k0 - in_size), dtype=x.dtype)], axis=-1)

    h = x
    for i in range(n_linear):
        w = p[2 * i][...]
        b = p[2 * i + 1][...]
        acc = jnp.dot(h.astype(w.dtype), w, preferred_element_type=jnp.float32)
        acc = acc + b.astype(jnp.float32)
        if i < n_linear - 1:
            acc = jnp.maximum(acc, 0.0)          # ReLU on all but the last layer
            h = acc.astype(w.dtype)              # keep MXU-native dtype for next matmul
        else:
            h = acc
    o_ref[...] = h.astype(o_ref.dtype)           # (tb, output_size), written directly


def ik_model_forward(x, params, *, batch_tile=2048):
    """x: (batch, input_size).  params: list of (W, b) with W (in, out), b (1, out)."""
    batch, in_size = x.shape
    n_linear = len(params)
    out_size = params[-1][0].shape[1]
    out_dtype = x.dtype

    # Real / padded feature widths.  Only the tiny weights are lane-padded
    # (one-time, VMEM-resident); HBM activations keep their real widths.
    widths = [in_size] + [w.shape[1] for (w, _) in params]
    pwidths = [_round_up(d, _LANE) for d in widths[:-1]] + [widths[-1]]

    flat_params = []
    for li, (w, b) in enumerate(params):
        pin, pout = pwidths[li], pwidths[li + 1]
        b2 = b.reshape(1, -1)
        if (pin, pout) == tuple(w.shape):
            w_p = w
        else:
            w_p = jnp.zeros((pin, pout), w.dtype).at[: w.shape[0], : w.shape[1]].set(w)
        if b2.shape[1] == pout:
            b_p = b2
        else:
            b_p = jnp.zeros((1, pout), b.dtype).at[:, : b2.shape[1]].set(b2)
        flat_params.extend([w_p, b_p])

    # ---- batch tile sizing ---------------------------------------------------
    param_vmem = sum(_tile_bytes(p.shape[0], p.shape[1], p.dtype.itemsize)
                     for p in flat_params)
    max_pw = max(pwidths)

    def _vmem_estimate(t):
        return (2 * _tile_bytes(t, in_size, x.dtype.itemsize)            # double-buffered x blocks
                + 2 * _tile_bytes(t, out_size, jnp.dtype(out_dtype).itemsize)  # out blocks
                + 2 * param_vmem                                         # resident params (2 bufs)
                + 4 * t * max_pw * 4)                                    # live f32 intermediates

    batch_rows = _round_up(batch, _SUBLANE)
    tb = min(_round_up(batch_tile, _SUBLANE), batch_rows)
    # v7x has 2 TensorCores: keep >=2 "parallel" grid steps when the batch is
    # large enough that each half is still a healthy tile (no-op on v5e/v6e).
    if batch_rows >= 2 * _MIN_SPLIT_ROWS:
        tb = min(tb, _round_up(_cdiv(batch, 2), _SUBLANE))
    while tb > _SUBLANE and _vmem_estimate(tb) > _VMEM_BUDGET:
        tb = max(_SUBLANE, _round_up(tb // 2, _SUBLANE))
    # TODO(synk): if resident weights alone exceed the scoped VMEM limit (hidden
    # sizes >= ~2048 f32 on v7x's 64 MiB), stream them via a K/N grid axis or
    # pltpu.emit_pipeline instead of only shrinking the batch tile.

    grid = (_cdiv(batch, tb),)   # partial edge block: OOB input rows undefined, OOB writes dropped

    x_spec = pl.BlockSpec((tb, in_size), lambda i: (i, 0))
    out_spec = pl.BlockSpec((tb, out_size), lambda i: (i, 0))
    param_specs = []
    for li in range(n_linear):
        pin, pout = pwidths[li], pwidths[li + 1]
        # Constant index_map -> weights/biases stay VMEM-resident across steps.
        param_specs.append(pl.BlockSpec((pin, pout), lambda i: (0, 0)))
        param_specs.append(pl.BlockSpec((1, pout), lambda i: (0, 0)))

    # Cost estimate from the REAL (unpadded) dims.
    flops = 2 * batch * sum(widths[i] * widths[i + 1] for i in range(n_linear))
    bytes_accessed = (x.size * x.dtype.itemsize
                      + batch * out_size * jnp.dtype(out_dtype).itemsize
                      + sum(w.size * w.dtype.itemsize + b.size * b.dtype.itemsize
                            for (w, b) in params))

    kernel = functools.partial(_mlp_kernel, n_linear)

    return pl.pallas_call(
        kernel,
        out_shape=jax.ShapeDtypeStruct((batch, out_size), out_dtype),
        grid=grid,
        in_specs=[x_spec] + param_specs,
        out_specs=out_spec,
        compiler_params=pltpu.CompilerParams(
            dimension_semantics=("parallel",),       # batch axis -> both TCs on v7x
            vmem_limit_bytes=_VMEM_LIMIT_BYTES,
        ),
        cost_estimate=pl.CostEstimate(
            flops=flops, bytes_accessed=bytes_accessed, transcendentals=0),
    )(x, *flat_params)


def init_params(key, input_size, hidden_size, hidden_layer, output_size,
                dtype=jnp.float32):
    """Deterministic synthetic init (uniform, PyTorch-Linear-style bounds)."""
    sizes = [(input_size, hidden_size)]
    sizes += [(hidden_size, hidden_size)] * hidden_layer
    sizes += [(hidden_size, output_size)]
    params = []
    for (fan_in, fan_out) in sizes:
        key, kw, kb = jax.random.split(key, 3)
        bound = 1.0 / float(fan_in) ** 0.5
        w = jax.random.uniform(kw, (fan_in, fan_out), jnp.float32, -bound, bound)
        b = jax.random.uniform(kb, (1, fan_out), jnp.float32, -bound, bound)
        params.append((w.astype(dtype), b.astype(dtype)))
    return params


def ik_model_reference(x, params, activation_dtype=None):
    """Pure-JAX reference.  activation_dtype (e.g. bf16) mimics the kernel's
    intentional inter-layer re-quantization when params are low precision."""
    h = x
    for i, (w, b) in enumerate(params):
        if activation_dtype is not None:
            h = h.astype(activation_dtype)
        h = h.astype(jnp.float32) @ w.astype(jnp.float32) + b.reshape(1, -1).astype(jnp.float32)
        if i < len(params) - 1:
            h = jnp.maximum(h, 0.0)
    return h


if __name__ == "__main__":
    # Small shapes consistent with an IK MLP: pose -> joint angles.
    batch, input_size, hidden_size, hidden_layer, output_size = 8, 6, 32, 2, 4

    key = jax.random.PRNGKey(0)
    key, kx = jax.random.split(key)
    x = jax.random.normal(kx, (batch, input_size), jnp.float32)

    params = init_params(key, input_size, hidden_size, hidden_layer, output_size)

    # --- tiny batch (single grid step) ---------------------------------------
    out = jax.block_until_ready(ik_model_forward(x, params))
    ref = ik_model_reference(x, params)
    assert out.shape == (batch, output_size)
    assert out.dtype == x.dtype
    assert jnp.allclose(out, ref, atol=1e-5, rtol=1e-5), "mismatch (small batch, f32)"

    # --- larger batch: multi-step "parallel" grid + partial edge block --------
    big_batch = 1000
    key, kb = jax.random.split(key)
    xb = jax.random.normal(kb, (big_batch, input_size), jnp.float32)
    outb = jax.block_until_ready(ik_model_forward(xb, params))
    refb = ik_model_reference(xb, params)
    assert outb.shape == (big_batch, output_size)
    assert jnp.allclose(outb, refb, atol=1e-5, rtol=1e-5), "mismatch (big batch, f32)"

    # --- bf16 weights: halves resident-weight VMEM / DMA, full-rate MXU.
    # Inter-layer activations are intentionally re-quantized to bf16, so the
    # comparison uses a matching reference and a looser tolerance.
    params_bf16 = [(w.astype(jnp.bfloat16), b.astype(jnp.bfloat16)) for (w, b) in params]
    outh = jax.block_until_ready(ik_model_forward(xb, params_bf16))
    refh = ik_model_reference(xb, params_bf16, activation_dtype=jnp.bfloat16)
    assert outh.shape == (big_batch, output_size)
    assert outh.dtype == xb.dtype
    assert jnp.allclose(outh, refh, atol=1e-2, rtol=1e-2), "mismatch (big batch, bf16 params)"

    print("KERNEL_OK")
</pallas_src>

<mosaic_0001>
module attributes {stable_mosaic.version = 11 : i64} {
  func.func @_mlp_kernel(%arg0: i32, %arg1: memref<8x6xf32, #tpu.memory_space<vmem>>, %arg2: memref<128x128xf32, #tpu.memory_space<vmem>>, %arg3: memref<1x128xf32, #tpu.memory_space<vmem>>, %arg4: memref<128x128xf32, #tpu.memory_space<vmem>>, %arg5: memref<1x128xf32, #tpu.memory_space<vmem>>, %arg6: memref<128x128xf32, #tpu.memory_space<vmem>>, %arg7: memref<1x128xf32, #tpu.memory_space<vmem>>, %arg8: memref<128x4xf32, #tpu.memory_space<vmem>>, %arg9: memref<1x4xf32, #tpu.memory_space<vmem>>, %arg10: memref<8x4xf32, #tpu.memory_space<vmem>>) attributes {dimension_semantics = [#tpu.dimension_semantics<parallel>], iteration_bounds = array<i64: 1>, scalar_prefetch = 0 : i64, scratch_operands = 0 : i64, tpu.core_type = #tpu.core_type<tc>, window_params = [{transform_indices = @transform_0, window_bounds = array<i64: 8, 6>}, {pipeline_mode = #tpu.pipeline_mode<synchronous>, transform_indices = @transform_1, window_bounds = array<i64: 128, 128>}, {pipeline_mode = #tpu.pipeline_mode<synchronous>, transform_indices = @transform_2, window_bounds = array<i64: 1, 128>}, {pipeline_mode = #tpu.pipeline_mode<synchronous>, transform_indices = @transform_3, window_bounds = array<i64: 128, 128>}, {pipeline_mode = #tpu.pipeline_mode<synchronous>, transform_indices = @transform_4, window_bounds = array<i64: 1, 128>}, {pipeline_mode = #tpu.pipeline_mode<synchronous>, transform_indices = @transform_5, window_bounds = array<i64: 128, 128>}, {pipeline_mode = #tpu.pipeline_mode<synchronous>, transform_indices = @transform_6, window_bounds = array<i64: 1, 128>}, {pipeline_mode = #tpu.pipeline_mode<synchronous>, transform_indices = @transform_7, window_bounds = array<i64: 128, 4>}, {pipeline_mode = #tpu.pipeline_mode<synchronous>, transform_indices = @transform_8, window_bounds = array<i64: 1, 4>}, {transform_indices = @transform_9, window_bounds = array<i64: 8, 4>}]} {
    %c0 = arith.constant 0 : index
    %c0_0 = arith.constant 0 : index
    %0 = vector.load %arg1[%c0, %c0_0] : memref<8x6xf32, #tpu.memory_space<vmem>>, vector<8x6xf32>
    %cst = arith.constant 0.000000e+00 : f32
    %1 = vector.broadcast %cst : f32 to vector<8x122xf32>
    %2 = tpu.concatenate %0, %1 in 1 : vector<8x6xf32>, vector<8x122xf32> -> vector<8x128xf32>
    %c0_1 = arith.constant 0 : index
    %c0_2 = arith.constant 0 : index
    %3 = vector.load %arg2[%c0_1, %c0_2] : memref<128x128xf32, #tpu.memory_space<vmem>>, vector<128x128xf32>
    %c0_3 = arith.constant 0 : index
    %c0_4 = arith.constant 0 : index
    %4 = vector.load %arg3[%c0_3, %c0_4] : memref<1x128xf32, #tpu.memory_space<vmem>>, vector<1x128xf32>
    %cst_5 = arith.constant dense<0.000000e+00> : vector<8x128xf32>
    %5 = tpu.matmul %2, %3, %cst_5 {dimension_numbers = #tpu.dot_dimension_numbers<[1], [0], [0], [1], [0, 0, 1, 1], [], []>} : vector<8x128xf32>, vector<128x128xf32>, vector<8x128xf32> -> vector<8x128xf32>
    %6 = vector.broadcast %4 : vector<1x128xf32> to vector<8x128xf32>
    %7 = arith.addf %5, %6 : vector<8x128xf32>
    %cst_6 = arith.constant 0.000000e+00 : f32
    %8 = vector.broadcast %cst_6 : f32 to vector<8x128xf32>
    %9 = arith.maximumf %7, %8 : vector<8x128xf32>
    %c0_7 = arith.constant 0 : index
    %c0_8 = arith.constant 0 : index
    %10 = vector.load %arg4[%c0_7, %c0_8] : memref<128x128xf32, #tpu.memory_space<vmem>>, vector<128x128xf32>
    %c0_9 = arith.constant 0 : index
    %c0_10 = arith.constant 0 : index
    %11 = vector.load %arg5[%c0_9, %c0_10] : memref<1x128xf32, #tpu.memory_space<vmem>>, vector<1x128xf32>
    %cst_11 = arith.constant dense<0.000000e+00> : vector<8x128xf32>
    %12 = tpu.matmul %9, %10, %cst_11 {dimension_numbers = #tpu.dot_dimension_numbers<[1], [0], [0], [1], [0, 0, 1, 1], [], []>} : vector<8x128xf32>, vector<128x128xf32>, vector<8x128xf32> -> vector<8x128xf32>
    %13 = vector.broadcast %11 : vector<1x128xf32> to vector<8x128xf32>
    %14 = arith.addf %12, %13 : vector<8x128xf32>
    %cst_12 = arith.constant 0.000000e+00 : f32
    %15 = vector.broadcast %cst_12 : f32 to vector<8x128xf32>
    %16 = arith.maximumf %14, %15 : vector<8x128xf32>
    %c0_13 = arith.constant 0 : index
    %c0_14 = arith.constant 0 : index
    %17 = vector.load %arg6[%c0_13, %c0_14] : memref<128x128xf32, #tpu.memory_space<vmem>>, vector<128x128xf32>
    %c0_15 = arith.constant 0 : index
    %c0_16 = arith.constant 0 : index
    %18 = vector.load %arg7[%c0_15, %c0_16] : memref<1x128xf32, #tpu.memory_space<vmem>>, vector<1x128xf32>
    %cst_17 = arith.constant dense<0.000000e+00> : vector<8x128xf32>
    %19 = tpu.matmul %16, %17, %cst_17 {dimension_numbers = #tpu.dot_dimension_numbers<[1], [0], [0], [1], [0, 0, 1, 1], [], []>} : vector<8x128xf32>, vector<128x128xf32>, vector<8x128xf32> -> vector<8x128xf32>
    %20 = vector.broadcast %18 : vector<1x128xf32> to vector<8x128xf32>
    %21 = arith.addf %19, %20 : vector<8x128xf32>
    %cst_18 = arith.constant 0.000000e+00 : f32
    %22 = vector.broadcast %cst_18 : f32 to vector<8x128xf32>
    %23 = arith.maximumf %21, %22 : vector<8x128xf32>
    %c0_19 = arith.constant 0 : index
    %c0_20 = arith.constant 0 : index
    %24 = vector.load %arg8[%c0_19, %c0_20] : memref<128x4xf32, #tpu.memory_space<vmem>>, vector<128x4xf32>
    %c0_21 = arith.constant 0 : index
    %c0_22 = arith.constant 0 : index
    %25 = vector.load %arg9[%c0_21, %c0_22] : memref<1x4xf32, #tpu.memory_space<vmem>>, vector<1x4xf32>
    %cst_23 = arith.constant dense<0.000000e+00> : vector<8x4xf32>
    %26 = tpu.matmul %23, %24, %cst_23 {dimension_numbers = #tpu.dot_dimension_numbers<[1], [0], [0], [1], [0, 0, 1, 1], [], []>} : vector<8x128xf32>, vector<128x4xf32>, vector<8x4xf32> -> vector<8x4xf32>
    %27 = vector.broadcast %25 : vector<1x4xf32> to vector<8x4xf32>
    %28 = arith.addf %26, %27 : vector<8x4xf32>
    %c0_24 = arith.constant 0 : index
    %c0_25 = arith.constant 0 : index
    %29 = vector.load %arg10[%c0_24, %c0_25] : memref<8x4xf32, #tpu.memory_space<vmem>>, vector<8x4xf32>
    tpu.vector_store %arg10[%c0_24, %c0_25], %28 {strides = array<i32>} : memref<8x4xf32, #tpu.memory_space<vmem>>, vector<8x4xf32>,
    return
  }
  func.func @transform_0(%arg0: i32) -> (i32, i32) {
    %c0_i32 = arith.constant 0 : i32
    %c0_i32_0 = arith.constant 0 : i32
    return %arg0, %c0_i32 : i32, i32
  }
  func.func @transform_1(%arg0: i32) -> (i32, i32) {
    %c0_i32 = arith.constant 0 : i32
    %c0_i32_0 = arith.constant 0 : i32
    %c0_i32_1 = arith.constant 0 : i32
    return %c0_i32, %c0_i32_0 : i32, i32
  }
  func.func @transform_2(%arg0: i32) -> (i32, i32) {
    %c0_i32 = arith.constant 0 : i32
    %c0_i32_0 = arith.constant 0 : i32
    %c0_i32_1 = arith.constant 0 : i32
    return %c0_i32, %c0_i32_0 : i32, i32
  }
  func.func @transform_3(%arg0: i32) -> (i32, i32) {
    %c0_i32 = arith.constant 0 : i32
    %c0_i32_0 = arith.constant 0 : i32
    %c0_i32_1 = arith.constant 0 : i32
    return %c0_i32, %c0_i32_0 : i32, i32
  }
  func.func @transform_4(%arg0: i32) -> (i32, i32) {
    %c0_i32 = arith.constant 0 : i32
    %c0_i32_0 = arith.constant 0 : i32
    %c0_i32_1 = arith.constant 0 : i32
    return %c0_i32, %c0_i32_0 : i32, i32
  }
  func.func @transform_5(%arg0: i32) -> (i32, i32) {
    %c0_i32 = arith.constant 0 : i32
    %c0_i32_0 = arith.constant 0 : i32
    %c0_i32_1 = arith.constant 0 : i32
    return %c0_i32, %c0_i32_0 : i32, i32
  }
  func.func @transform_6(%arg0: i32) -> (i32, i32) {
    %c0_i32 = arith.constant 0 : i32
    %c0_i32_0 = arith.constant 0 : i32
    %c0_i32_1 = arith.constant 0 : i32
    return %c0_i32, %c0_i32_0 : i32, i32
  }
  func.func @transform_7(%arg0: i32) -> (i32, i32) {
    %c0_i32 = arith.constant 0 : i32
    %c0_i32_0 = arith.constant 0 : i32
    %c0_i32_1 = arith.constant 0 : i32
    return %c0_i32, %c0_i32_0 : i32, i32
  }
  func.func @transform_8(%arg0: i32) -> (i32, i32) {
    %c0_i32 = arith.constant 0 : i32
    %c0_i32_0 = arith.constant 0 : i32
    %c0_i32_1 = arith.constant 0 : i32
    return %c0_i32, %c0_i32_0 : i32, i32
  }
  func.func @transform_9(%arg0: i32) -> (i32, i32) {
    %c0_i32 = arith.constant 0 : i32
    %c0_i32_0 = arith.constant 0 : i32
    return %arg0, %c0_i32 : i32, i32
  }
}

</mosaic_0001>

<bundles_post_ra>
// kernel: tpu_custom_call.1
= control target key start
LH: loop header
LB: loop body
LE: loop exit
PB: predicated region body
PF: predicated region fallthrough
CT: control target
= control target key end

     0   :  { %14 = vsyncpa [#allocation3], 0  ;;  %s990_s0 = inlined_call_operand.hbm [shape: f32[8,6], index: 0, kind: input, shape index: {}]   ;;  %s991_s1 = inlined_call_operand.vmem [shape: f32[128,128], index: 1, kind: input, shape index: {}]   ;;  %s992_s2 = inlined_call_operand.vmem [shape: f32[1,128], index: 2, kind: input, shape index: {}]   ;;  %s993_s3 = inlined_call_operand.hbm [shape: f32[128,128], index: 3, kind: input, shape index: {}]   ;;  %s994_s4 = inlined_call_operand.vmem [shape: f32[1,128], index: 4, kind: input, shape index: {}]   ;;  %s995_s5 = inlined_call_operand.hbm [shape: f32[128,128], index: 5, kind: input, shape index: {}]   ;;  %s996_s6 = inlined_call_operand.vmem [shape: f32[1,128], index: 6, kind: input, shape index: {}]   ;;  %s997_s7 = inlined_call_operand.vmem [shape: f32[128,4], index: 7, kind: input, shape index: {}]   ;;  %s998_s8 = inlined_call_operand.vmem [shape: f32[1,4], index: 8, kind: input, shape index: {}]   ;;  %s999_s9 = inlined_call_operand.vmem [shape: f32[8,4], index: 9, kind: output, shape index: {}]  }
   0x1   :  { %15 = vsyncpa [#allocation5], 0  ;;  %s741_s30 = smov [#allocation4]  }
   0x2   :  { %s35_s10 = sshll.u32 %s741_s30, 4  ;;  %s36_s10 = int_to_ptr.vmem [resolvable:$true] %s35_s10 }
   0x3   :  { %s685_s11 = scalar_lea.vmem %s36_s10, 2048  ;;  %p690_p1 = scmp.lt.s32.totalorder %s36_s10, %s36_s10 }
   0x4   :  { %p686_p0 = scmp.ne.s32.totalorder %s36_s10, %s685_s11  ;;  %p691_p2 = scmp.lt.s32.totalorder %s685_s11, %s685_s11 }
   0x6   :  { %p692_p3 = por %p691_p2, %p690_p1 }
   0x8   :  { %p693_p4 = pnand %p692_p3, %p686_p0 }
   0xa   :  { %696 = shalt.err (!%p693_p4)
}
   0xb   :  { %s742_s12 = smov 128   ;;  %s743_s13 = smov 8  }
   0xc   :  { %41 = dma.hbm_to_vmem [thread:$0]  %s993_s3, 2048, %s36_s10, [#allocation5], %s742_s12, %s742_s12, %s743_s13  }
   0xd   :  { %s744_s16 = smov [#allocation2]   ;;  %s745_s18 = smov [#allocation6]  }
   0xe   :  { %s22_s17 = sshll.u32 %s744_s16, 4  ;;  %s49_s19 = sshll.u32 %s745_s18, 4  ;;  %s23_s17 = int_to_ptr.vmem [resolvable:$true] %s22_s17  ;;  %s50_s19 = int_to_ptr.vmem [resolvable:$true] %s49_s19 }
   0xf   :  { %s705_s20 = scalar_lea.vmem %s23_s17, 128  ;;  %p710_p6 = scmp.lt.s32.totalorder %s23_s17, %s23_s17 }
  0x10   :  { %p706_p5 = scmp.ne.s32.totalorder %s23_s17, %s705_s20  ;;  %p711_p7 = scmp.lt.s32.totalorder %s705_s20, %s705_s20 }
  0x12   :  { %p712_p8 = por %p711_p7, %p710_p6 }
  0x14   :  { %p713_p9 = pnand %p712_p8, %p706_p5 }
  0x16   :  { %716 = shalt.err (!%p713_p9)
}
  0x17   :  { %25 = dma.hbm_to_vmem [thread:$0]  %s990_s0, 128, %s23_s17, [#allocation3]  }
  0x18   :  { %s725_s23 = scalar_lea.vmem %s50_s19, 2048  ;;  %p730_p11 = scmp.lt.s32.totalorder %s50_s19, %s50_s19 }
  0x19   :  { %p726_p10 = scmp.ne.s32.totalorder %s50_s19, %s725_s23  ;;  %p731_p12 = scmp.lt.s32.totalorder %s725_s23, %s725_s23 }
  0x1b   :  { %p732_p13 = por %p731_p12, %p730_p11 }
  0x1d   :  { %p733_p0 = pnand %p732_p13, %p726_p10 }
  0x1f   :  { %736 = shalt.err (!%p733_p0)
}
  0x20   :  { %55 = dma.hbm_to_vmem [thread:$0]  %s995_s5, 2048, %s50_s19, [#allocation5], %s742_s12, %s742_s12, %s743_s13  }
  0x21   :  { %737 = dma.done.wait [#allocation3], 128  }
  0x22   :  { %738 = vsyncadd [#allocation3], 4294967168 }
  0x23   :  { %739 = dma.done.wait [#allocation5], 4096  }
  0x24   :  { %740 = vsyncadd [#allocation5], 4294963200  ;;  %v746_v0 = vmov 0.0   ;;  %vm747_vm0 = vmmov 0   ;;  %v89_v1 = vld [vmem:[%s991_s1 + $0x78] sm:$0xff]  ;;  %v88_v2 = vld [vmem:[%s991_s1 + $0x70] sm:$0xff] }
  0x25   :  { %530 = vmatprep.subr.mxu0 %v746_v0  ;;  %562 = vmatprep.mubr.msk.f32.mxu0 %vm747_vm0, %v746_v0  ;;  %v87_v3 = vld [vmem:[%s991_s1 + $0x68] sm:$0xff]  ;;  %v86_v4 = vld [vmem:[%s991_s1 + $0x60] sm:$0xff]  ;;  %v85_v6 = vld [vmem:[%s991_s1 + $0x58] sm:$0xff]  ;;  %vm72_vm1 = vcmask 48128   ;;  %vm449_vm2 = vcmask 31744  }
  0x26   :  { %565 = vmatprep.subr.mxu1 %v746_v0  ;;  %597 = vmatprep.mubr.msk.f32.mxu1 %vm747_vm0, %v746_v0  ;;  %v183_v5 = vld [vmem:[#allocation4 + $0x78] sm:$0xff]  ;;  %v182_v7 = vld [vmem:[#allocation4 + $0x70] sm:$0xff]  ;;  %v181_v8 = vld [vmem:[#allocation4 + $0x68] sm:$0xff] }
  0x27   :  { %531 = vmatpush3.msra.mxu0 %v89_v1  ;;  %566 = vmatpush3.msra.mxu1 %v183_v5  ;;  %v84_v9 = vld [vmem:[%s991_s1 + $0x50] sm:$0xff]  ;;  %v180_v10 = vld [vmem:[#allocation4 + $0x60] sm:$0xff]  ;;  %v179_v12 = vld [vmem:[#allocation4 + $0x58] sm:$0xff] }
  0x28   :  { %532 = vmatprep.subr.mxu0 %v746_v0  ;;  %567 = vmatprep.subr.mxu1 %v746_v0  ;;  %v83_v11 = vld [vmem:[%s991_s1 + $0x48] sm:$0xff]  ;;  %v82_v13 = vld [vmem:[%s991_s1 + $0x40] sm:$0xff]  ;;  %v178_v14 = vld [vmem:[#allocation4 + $0x50] sm:$0xff] }
  0x29   :  { %533 = vmatpush3.msra.mxu0 %v88_v2  ;;  %568 = vmatpush3.msra.mxu1 %v182_v7  ;;  %v81_v15 = vld [vmem:[%s991_s1 + $0x38] sm:$0xff]  ;;  %v177_v16 = vld [vmem:[#allocation4 + $0x48] sm:$0xff]  ;;  %v176_v18 = vld [vmem:[#allocation4 + $0x40] sm:$0xff] }
  0x2a   :  { %534 = vmatprep.subr.mxu0 %v746_v0  ;;  %569 = vmatprep.subr.mxu1 %v746_v0  ;;  %v80_v17 = vld [vmem:[%s991_s1 + $0x30] sm:$0xff]  ;;  %v79_v19 = vld [vmem:[%s991_s1 + $0x28] sm:$0xff]  ;;  %v175_v20 = vld [vmem:[#allocation4 + $0x38] sm:$0xff] }
  0x2b   :  { %535 = vmatpush3.msra.mxu0 %v87_v3  ;;  %570 = vmatpush3.msra.mxu1 %v181_v8  ;;  %v78_v21 = vld [vmem:[%s991_s1 + $0x20] sm:$0xff]  ;;  %v174_v22 = vld [vmem:[#allocation4 + $0x30] sm:$0xff]  ;;  %v173_v24 = vld [vmem:[#allocation4 + $0x28] sm:$0xff] }
  0x2c   :  { %536 = vmatprep.subr.mxu0 %v746_v0  ;;  %571 = vmatprep.subr.mxu1 %v746_v0  ;;  %v77_v23 = vld [vmem:[%s991_s1 + $0x18] sm:$0xff]  ;;  %v76_v25 = vld [vmem:[%s991_s1 + $0x10] sm:$0xff]  ;;  %v172_v26 = vld [vmem:[#allocation4 + $0x20] sm:$0xff] }
  0x2d   :  { %537 = vmatpush3.msra.mxu0 %v86_v4  ;;  %572 = vmatpush3.msra.mxu1 %v180_v10  ;;  %v75_v27 = vld [vmem:[%s991_s1 + $0x8] sm:$0xff]  ;;  %v171_v28 = vld [vmem:[#allocation4 + $0x18] sm:$0xff]  ;;  %v170_v31 = vld [vmem:[#allocation4 + $0x10] sm:$0xff] }
  0x2e   :  { %538 = vmatprep.subr.mxu0 %v746_v0  ;;  %573 = vmatprep.subr.mxu1 %v746_v0  ;;  %v74_v29 = vld [vmem:[%s991_s1] sm:$0xff]  ;;  %v169_v32 = vld [vmem:[#allocation4 + $0x8] sm:$0xff]  ;;  %v168_v33 = vld [vmem:[#allocation4] sm:$0xff] }
  0x2f   :  { %539 = vmatpush3.msra.mxu0 %v85_v6  ;;  %574 = vmatpush3.msra.mxu1 %v179_v12  ;;  %v71_v30 = vld [vmem:[#allocation2] sm:$0xff]  ;;  %v276_v35 = vld [vmem:[#allocation6 + $0x70] sm:$0xff]  ;;  %v275_v36 = vld [vmem:[#allocation6 + $0x68] sm:$0xff] }
  0x30   :  { %540 = vmatprep.subr.mxu0 %v746_v0  ;;  %575 = vmatprep.subr.mxu1 %v746_v0  ;;  %v277_v34 = vld [vmem:[#allocation6 + $0x78] sm:$0xff]  ;;  %v274_v37 = vld [vmem:[#allocation6 + $0x60] sm:$0xff]  ;;  %v272_v39 = vld [vmem:[#allocation6 + $0x50] sm:$0xff] }
  0x31   :  { %541 = vmatpush3.msra.mxu0 %v84_v9  ;;  %576 = vmatpush3.msra.mxu1 %v178_v14  ;;  %v273_v38 = vld [vmem:[#allocation6 + $0x58] sm:$0xff]  ;;  %v271_v40 = vld [vmem:[#allocation6 + $0x48] sm:$0xff]  ;;  %v270_v41 = vld [vmem:[#allocation6 + $0x40] sm:$0xff] }
  0x32   :  { %542 = vmatprep.subr.mxu0 %v746_v0  ;;  %577 = vmatprep.subr.mxu1 %v746_v0  ;;  %v269_v42 = vld [vmem:[#allocation6 + $0x38] sm:$0xff]  ;;  %v268_v43 = vld [vmem:[#allocation6 + $0x30] sm:$0xff]  ;;  %v267_v44 = vld [vmem:[#allocation6 + $0x28] sm:$0xff] }
  0x33   :  { %543 = vmatpush3.msra.mxu0 %v83_v11  ;;  %578 = vmatpush3.msra.mxu1 %v177_v16  ;;  %v266_v45 = vld [vmem:[#allocation6 + $0x20] sm:$0xff]  ;;  %v265_v46 = vld [vmem:[#allocation6 + $0x18] sm:$0xff]  ;;  %v264_v52 = vld [vmem:[#allocation6 + $0x10] sm:$0xff] }
  0x34   :  { %544 = vmatprep.subr.mxu0 %v746_v0  ;;  %579 = vmatprep.subr.mxu1 %v746_v0  ;;  %v457_v47 = vld [vmem:[%s992_s2] ss:$0 sm:$0xff]  ;;  %v263_v53 = vld [vmem:[#allocation6 + $0x8] sm:$0xff]  ;;  %v262_v54 = vld [vmem:[#allocation6] sm:$0xff] }
  0x35   :  { %545 = vmatpush3.msra.mxu0 %v82_v13  ;;  %580 = vmatpush3.msra.mxu1 %v176_v18  ;;  %v371_v55 = vld [vmem:[%s997_s7 + $0x78] sm:$0xff]  ;;  %v370_v56 = vld [vmem:[%s997_s7 + $0x70] sm:$0xff]  ;;  %v369_v57 = vld [vmem:[%s997_s7 + $0x68] sm:$0xff] }
  0x36   :  { %546 = vmatprep.subr.mxu0 %v746_v0  ;;  %581 = vmatprep.subr.mxu1 %v746_v0  ;;  %v368_v58 = vld [vmem:[%s997_s7 + $0x60] sm:$0xff]  ;;  %v367_v59 = vld [vmem:[%s997_s7 + $0x58] sm:$0xff]  ;;  %v366_v60 = vld [vmem:[%s997_s7 + $0x50] sm:$0xff] }
  0x37   :  { %547 = vmatpush3.msra.mxu0 %v81_v15  ;;  %582 = vmatpush3.msra.mxu1 %v175_v20  ;;  %v365_v61 = vld [vmem:[%s997_s7 + $0x48] sm:$0xff]  ;;  %v364_v62 = vld [vmem:[%s997_s7 + $0x40] sm:$0xff]  ;;  %v363_v63 = vld [vmem:[%s997_s7 + $0x38] sm:$0xff] }
  0x38   :  { %548 = vmatprep.subr.mxu0 %v746_v0  ;;  %583 = vmatprep.subr.mxu1 %v746_v0  ;;  %v362_v1 = vld [vmem:[%s997_s7 + $0x30] sm:$0xff]  ;;  %v361_v2 = vld [vmem:[%s997_s7 + $0x28] sm:$0xff]  ;;  %v360_v3 = vld [vmem:[%s997_s7 + $0x20] sm:$0xff] }
  0x39   :  { %549 = vmatpush3.msra.mxu0 %v80_v17  ;;  %584 = vmatpush3.msra.mxu1 %v174_v22  ;;  %v359_v4 = vld [vmem:[%s997_s7 + $0x18] sm:$0xff]  ;;  %v459_v5 = vld [vmem:[%s994_s4] ss:$0 sm:$0xff]  ;;  %v358_v10 = vld [vmem:[%s997_s7 + $0x10] sm:$0xff] }
  0x3a   :  { %550 = vmatprep.subr.mxu0 %v746_v0  ;;  %585 = vmatprep.subr.mxu1 %v746_v0  ;;  %v357_v11 = vld [vmem:[%s997_s7 + $0x8] sm:$0xff]  ;;  %v356_v12 = vld [vmem:[%s997_s7] sm:$0xff] }
  0x3b   :  { %551 = vmatpush3.msra.mxu0 %v79_v19  ;;  %586 = vmatpush3.msra.mxu1 %v173_v24  ;;  %v460_v13 = vld [vmem:[%s996_s6] ss:$0 sm:$0xff] }
  0x3c   :  { %552 = vmatprep.subr.mxu0 %v746_v0  ;;  %587 = vmatprep.subr.mxu1 %v746_v0  ;;  %v461_v18 = vld [vmem:[%s998_s8] ss:$0 sm:$0xff] }
  0x3d   :  { %553 = vmatpush3.msra.mxu0 %v78_v21  ;;  %588 = vmatpush3.msra.mxu1 %v172_v26 }
  0x3e   :  { %554 = vmatprep.subr.mxu0 %v746_v0  ;;  %589 = vmatprep.subr.mxu1 %v746_v0 }
  0x3f   :  { %555 = vmatpush3.msra.mxu0 %v77_v23  ;;  %590 = vmatpush3.msra.mxu1 %v171_v28 }
  0x40   :  { %556 = vmatprep.subr.mxu0 %v746_v0  ;;  %591 = vmatprep.subr.mxu1 %v746_v0 }
  0x41   :  { %557 = vmatpush3.msra.mxu0 %v76_v25  ;;  %592 = vmatpush3.msra.mxu1 %v170_v31 }
  0x42   :  { %558 = vmatprep.subr.mxu0 %v746_v0  ;;  %593 = vmatprep.subr.mxu1 %v746_v0 }
  0x43   :  { %559 = vmatpush3.msra.mxu0 %v75_v27  ;;  %594 = vmatpush3.msra.mxu1 %v169_v32 }
  0x44   :  { %560 = vmatprep.subr.mxu0 %v746_v0  ;;  %595 = vmatprep.subr.mxu1 %v746_v0 }
  0x45   :  { %561 = vmatpush3.msra.mxu0 %v74_v29  ;;  %596 = vmatpush3.msra.mxu1 %v168_v33 }
  0x46   :  { %563 = vmatmul.mubr.msk.f32.vlgmr.msra.gmra.mxu0 %vm72_vm1, %v71_v30  ;;  %600 = vmatprep.subr.mxu0 %v746_v0 }
  0x47   :  { %632 = vmatprep.mubr.msk.f32.mxu0 %vm747_vm0, %v746_v0  ;;  %635 = vmatprep.subr.mxu1 %v746_v0 }
  0x48   :  { %601 = vmatpush3.msra.mxu0 %v277_v34 }
  0x49   :  { %602 = vmatprep.subr.mxu0 %v746_v0 }
  0x4a   :  { %603 = vmatpush3.msra.mxu0 %v276_v35 }
  0x4b   :  { %604 = vmatprep.subr.mxu0 %v746_v0 }
  0x4c   :  { %605 = vmatpush3.msra.mxu0 %v275_v36 }
  0x4d   :  { %606 = vmatprep.subr.mxu0 %v746_v0 }
  0x4e   :  { %607 = vmatpush3.msra.mxu0 %v274_v37 }
  0x4f   :  { %608 = vmatprep.subr.mxu0 %v746_v0 }
  0x50   :  { %609 = vmatpush3.msra.mxu0 %v273_v38 }
  0x51   :  { %610 = vmatprep.subr.mxu0 %v746_v0 }
  0x52   :  { %611 = vmatpush3.msra.mxu0 %v272_v39 }
  0x53   :  { %612 = vmatprep.subr.mxu0 %v746_v0 }
  0x54   :  { %613 = vmatpush3.msra.mxu0 %v271_v40 }
  0x55   :  { %614 = vmatprep.subr.mxu0 %v746_v0 }
  0x56   :  { %615 = vmatpush3.msra.mxu0 %v270_v41 }
  0x57   :  { %616 = vmatprep.subr.mxu0 %v746_v0 }
  0x58   :  { %617 = vmatpush3.msra.mxu0 %v269_v42 }
  0x59   :  { %618 = vmatprep.subr.mxu0 %v746_v0 }
  0x5a   :  { %619 = vmatpush3.msra.mxu0 %v268_v43 }
  0x5b   :  { %620 = vmatprep.subr.mxu0 %v746_v0 }
  0x5c   :  { %621 = vmatpush3.msra.mxu0 %v267_v44 }
  0x5d   :  { %622 = vmatprep.subr.mxu0 %v746_v0 }
  0x5e   :  { %623 = vmatpush3.msra.mxu0 %v266_v45 }
  0x5f   :  { %624 = vmatprep.subr.mxu0 %v746_v0 }
  0x60   :  { %625 = vmatpush3.msra.mxu0 %v265_v46 }
  0x61   :  { %626 = vmatprep.subr.mxu0 %v746_v0 }
  0x62   :  { %627 = vmatpush3.msra.mxu0 %v264_v52 }
  0x63   :  { %628 = vmatprep.subr.mxu0 %v746_v0 }
  0x64   :  { %629 = vmatpush3.msra.mxu0 %v263_v53 }
  0x65   :  { %630 = vmatprep.subr.mxu0 %v746_v0 }
  0x66   :  { %631 = vmatpush3.msra.mxu0 %v262_v54 }
 0x106   :  { %v163_v48 = vpop.f32.mrf.mxu0 }
 0x107   :  { %v164_v49 = vadd.f32 %v457_v47, %v163_v48 }
 0x108   :  { %v564_v50 = vpop.f32.mrf.mxu0 }
 0x109   :  { %v167_v51 = vmax.f32 %v164_v49, 0.0 }
 0x10b   :  { %598 = vmatmul.mubr.f32.vlgmr.msra.gmra.mxu1 %v167_v51 }
 0x10c   :  { %667 = vmatprep.mubr.msk.f32.mxu1 %vm747_vm0, %v746_v0  ;;  %636 = vmatpush3.msra.mxu1 %v371_v55 }
 0x10d   :  { %637 = vmatprep.subr.mxu1 %v746_v0 }
 0x10e   :  { %638 = vmatpush3.msra.mxu1 %v370_v56 }
 0x10f   :  { %639 = vmatprep.subr.mxu1 %v746_v0 }
 0x110   :  { %640 = vmatpush3.msra.mxu1 %v369_v57 }
 0x111   :  { %641 = vmatprep.subr.mxu1 %v746_v0 }
 0x112   :  { %642 = vmatpush3.msra.mxu1 %v368_v58 }
 0x113   :  { %643 = vmatprep.subr.mxu1 %v746_v0 }
 0x114   :  { %644 = vmatpush3.msra.mxu1 %v367_v59 }
 0x115   :  { %645 = vmatprep.subr.mxu1 %v746_v0 }
 0x116   :  { %646 = vmatpush3.msra.mxu1 %v366_v60 }
 0x117   :  { %647 = vmatprep.subr.mxu1 %v746_v0 }
 0x118   :  { %648 = vmatpush3.msra.mxu1 %v365_v61 }
 0x119   :  { %649 = vmatprep.subr.mxu1 %v746_v0 }
 0x11a   :  { %650 = vmatpush3.msra.mxu1 %v364_v62 }
 0x11b   :  { %651 = vmatprep.subr.mxu1 %v746_v0 }
 0x11c   :  { %652 = vmatpush3.msra.mxu1 %v363_v63 }
 0x11d   :  { %653 = vmatprep.subr.mxu1 %v746_v0 }
 0x11e   :  { %654 = vmatpush3.msra.mxu1 %v362_v1 }
 0x11f   :  { %655 = vmatprep.subr.mxu1 %v746_v0 }
 0x120   :  { %656 = vmatpush3.msra.mxu1 %v361_v2 }
 0x121   :  { %657 = vmatprep.subr.mxu1 %v746_v0 }
 0x122   :  { %658 = vmatpush3.msra.mxu1 %v360_v3 }
 0x123   :  { %659 = vmatprep.subr.mxu1 %v746_v0 }
 0x124   :  { %660 = vmatpush3.msra.mxu1 %v359_v4 }
 0x125   :  { %661 = vmatprep.subr.mxu1 %v746_v0 }
 0x126   :  { %662 = vmatpush3.msra.mxu1 %v358_v10 }
 0x127   :  { %663 = vmatprep.subr.mxu1 %v746_v0 }
 0x128   :  { %664 = vmatpush3.msra.mxu1 %v357_v11 }
 0x129   :  { %665 = vmatprep.subr.mxu1 %v746_v0 }
 0x12a   :  { %666 = vmatpush3.msra.mxu1 %v356_v12 }
 0x1cb   :  { %v257_v6 = vpop.f32.mrf.mxu1 }
 0x1cc   :  { %v258_v7 = vadd.f32 %v459_v5, %v257_v6 }
 0x1cd   :  { %v599_v8 = vpop.f32.mrf.mxu1 }
 0x1ce   :  { %v261_v9 = vmax.f32 %v258_v7, 0.0 }
 0x1d0   :  { %633 = vmatmul.mubr.f32.vlgmr.msra.gmra.mxu0 %v261_v9 }
 0x290   :  { %v351_v14 = vpop.f32.mrf.mxu0 }
 0x291   :  { %v352_v15 = vadd.f32 %v460_v13, %v351_v14 }
 0x292   :  { %v634_v16 = vpop.f32.mrf.mxu0 }
 0x293   :  { %v355_v17 = vmax.f32 %v352_v15, 0.0 }
 0x295   :  { %668 = vmatmul.mubr.f32.vlgmr.msra.gmra.mxu1 %v355_v17 }
 0x355   :  { %v445_v19 = vpop.f32.mrf.mxu1 }
 0x356   :  { %v446_v0 = vadd.f32 %v461_v18, %v445_v19 }
 0x357   :  { %v669_v20 = vpop.f32.mrf.mxu1 }
 0x358   :  { %450 = vst.msk [vmem:[%s999_s9] sm:$0xff] %vm449_vm2, %v446_v0 }
 0x359   :  { %455 = vsyncpa [#allocation3], 1 }
 0x35a   :  { %456 = vsyncpa [#allocation5], 1 }

</bundles_post_ra>
